<compile_context>
chip_gen: v5e
topology: v5e:2x2
jax: 0.10.0
libtpu: 0.0.40
codegen_flags: <defaults>
</compile_context>

<pallas_src>
import functools

import jax
import jax.numpy as jnp
from jax import lax
from jax.experimental import pallas as pl
from jax.experimental.pallas import tpu as pltpu


def _label_smoothing_kernel(pred_ref, tgt_ref, out_ref, *,
                            n_rows, n_cls, confidence, smooth_val):
    logits = pred_ref[...]                                  # (Np, Cp) f32 (padded)
    tgt = tgt_ref[...]                                      # (Np, 1)  int32 (padded)

    Np, Cp = logits.shape
    col_ids = lax.broadcasted_iota(jnp.int32, (Np, Cp), 1)
    col_valid = col_ids < n_cls

    # Padded class columns -> very negative so they vanish from the softmax.
    logits = jnp.where(col_valid, logits, jnp.float32(-1e30))

    # Numerically stable log-softmax along the class (lane) axis.
    row_max = jnp.max(logits, axis=-1, keepdims=True)       # (Np, 1)
    shifted = logits - row_max
    sumexp = jnp.sum(jnp.exp(shifted), axis=-1, keepdims=True)
    lsm = shifted - jnp.log(sumexp)                         # (Np, Cp)

    # One-hot of the target via iota compare (replaces torch scatter_).
    onehot = (col_ids == tgt).astype(jnp.float32)           # (Np, Cp)
    tgt_lsm = jnp.sum(lsm * onehot, axis=-1, keepdims=True)             # (Np, 1)
    sum_lsm = jnp.sum(jnp.where(col_valid, lsm, 0.0), axis=-1, keepdims=True)

    # -(confidence * lsm[t] + smooth_val * sum_{c != t} lsm[c])
    per_row = -(jnp.float32(confidence) * tgt_lsm
                + jnp.float32(smooth_val) * (sum_lsm - tgt_lsm))        # (Np, 1)

    # Mean over the real (unpadded) batch rows only.
    row_ids = lax.broadcasted_iota(jnp.int32, (Np, 1), 0)
    row_mask = (row_ids < n_rows).astype(jnp.float32)
    loss = jnp.sum(per_row * row_mask) / jnp.float32(n_rows)

    out_ref[0, 0] = loss


class LabelSmoothingLossPallas:
    """JAX/Pallas re-implementation of LabelSmoothingLoss.forward."""

    def __init__(self, classes, smoothing=0.1, dim=-1):
        assert dim in (-1, 1), "only 2-D pred with classes on the last axis is supported"
        self.cls = int(classes)
        self.smoothing = float(smoothing)
        self.confidence = 1.0 - self.smoothing

    def __call__(self, pred, target):
        N, C = pred.shape
        assert C == self.cls, f"pred has {C} classes, module configured for {self.cls}"

        # Pad to TPU-friendly tile multiples (sublane 8, lane 128); masking inside
        # the kernel keeps the math exact.
        Np = ((N + 7) // 8) * 8
        Cp = ((C + 127) // 128) * 128
        pred_p = jnp.pad(pred.astype(jnp.float32), ((0, Np - N), (0, Cp - C)))
        tgt_p = jnp.pad(target.astype(jnp.int32), (0, Np - N)).reshape(Np, 1)

        kernel = functools.partial(
            _label_smoothing_kernel,
            n_rows=N, n_cls=C,
            confidence=self.confidence,
            smooth_val=self.smoothing / (self.cls - 1),
        )

        out = pl.pallas_call(
            kernel,
            out_shape=jax.ShapeDtypeStruct((1, 1), jnp.float32),
            in_specs=[pl.BlockSpec(memory_space=pltpu.MemorySpace.VMEM),
                      pl.BlockSpec(memory_space=pltpu.MemorySpace.VMEM)],
            out_specs=pl.BlockSpec(memory_space=pltpu.MemorySpace.SMEM),
        )(pred_p, tgt_p)
        return out[0, 0]


def _reference(pred, target, classes, smoothing):
    confidence = 1.0 - smoothing
    lsm = jax.nn.log_softmax(pred.astype(jnp.float32), axis=-1)
    true = jnp.full_like(lsm, smoothing / (classes - 1))
    true = true.at[jnp.arange(pred.shape[0]), target].set(confidence)
    return jnp.mean(jnp.sum(-true * lsm, axis=-1))


if __name__ == "__main__":
    key = jax.random.PRNGKey(0)
    k1, k2 = jax.random.split(key)

    N, C = 8, 128  # batch=8, classes=128 (lane/sublane aligned; padding path is a no-op)
    pred = jax.random.normal(k1, (N, C), dtype=jnp.float32)
    target = jax.random.randint(k2, (N,), 0, C, dtype=jnp.int32)

    mod = LabelSmoothingLossPallas(classes=C, smoothing=0.1)
    loss = jax.block_until_ready(mod(pred, target))

    ref = float(_reference(pred, target, C, 0.1))
    assert abs(float(loss) - ref) <= 1e-4 * max(1.0, abs(ref)), (float(loss), ref)

    print("KERNEL_OK")
</pallas_src>

<mosaic_0001>
module attributes {stable_mosaic.version = 11 : i64} {
  func.func @_label_smoothing_kernel(%arg0: memref<8x128xf32, #tpu.memory_space<vmem>>, %arg1: memref<8x1xi32, #tpu.memory_space<vmem>>, %arg2: memref<1x1xf32, #tpu.memory_space<smem>>) attributes {dimension_semantics = [], scalar_prefetch = 0 : i64, scratch_operands = 0 : i64, tpu.core_type = #tpu.core_type<tc>} {
    %c0 = arith.constant 0 : index
    %c0_0 = arith.constant 0 : index
    %0 = vector.load %arg0[%c0, %c0_0] : memref<8x128xf32, #tpu.memory_space<vmem>>, vector<8x128xf32>
    %c0_1 = arith.constant 0 : index
    %c0_2 = arith.constant 0 : index
    %1 = vector.load %arg1[%c0_1, %c0_2] : memref<8x1xi32, #tpu.memory_space<vmem>>, vector<8x1xi32>
    %2 = tpu.iota {dimensions = array<i32: 1>} : vector<8x128xi32>
    %c128_i32 = arith.constant 128 : i32
    %3 = vector.broadcast %c128_i32 : i32 to vector<8x128xi32>
    %4 = arith.cmpi slt, %2, %3 : vector<8x128xi32>
    %cst = arith.constant -1.000000e+30 : f32
    %5 = vector.broadcast %cst : f32 to vector<8x128xf32>
    %6 = arith.select %4, %0, %5 : vector<8x128xi1>, vector<8x128xf32>
    %cst_3 = arith.constant dense<0xFF800000> : vector<8xf32>
    %7 = vector.multi_reduction <maximumf>, %6, %cst_3 [1] : vector<8x128xf32> to vector<8xf32>
    %8 = vector.shape_cast %7 : vector<8xf32> to vector<8x1xf32>
    %9 = vector.broadcast %8 : vector<8x1xf32> to vector<8x128xf32>
    %10 = arith.subf %6, %9 : vector<8x128xf32>
    %11 = math.exp %10 : vector<8x128xf32>
    %cst_4 = arith.constant dense<0.000000e+00> : vector<8xf32>
    %12 = vector.multi_reduction <add>, %11, %cst_4 [1] : vector<8x128xf32> to vector<8xf32>
    %13 = vector.shape_cast %12 : vector<8xf32> to vector<8x1xf32>
    %14 = math.log %13 : vector<8x1xf32>
    %15 = vector.broadcast %14 : vector<8x1xf32> to vector<8x128xf32>
    %16 = arith.subf %10, %15 : vector<8x128xf32>
    %17 = vector.broadcast %1 : vector<8x1xi32> to vector<8x128xi32>
    %18 = arith.cmpi eq, %2, %17 : vector<8x128xi32>
    %19 = arith.extui %18 : vector<8x128xi1> to vector<8x128xi32>
    %20 = arith.sitofp %19 : vector<8x128xi32> to vector<8x128xf32>
    %21 = arith.mulf %16, %20 : vector<8x128xf32>
    %cst_5 = arith.constant dense<0.000000e+00> : vector<8xf32>
    %22 = vector.multi_reduction <add>, %21, %cst_5 [1] : vector<8x128xf32> to vector<8xf32>
    %23 = vector.shape_cast %22 : vector<8xf32> to vector<8x1xf32>
    %cst_6 = arith.constant 0.000000e+00 : f32
    %24 = vector.broadcast %cst_6 : f32 to vector<8x128xf32>
    %25 = arith.select %4, %16, %24 : vector<8x128xi1>, vector<8x128xf32>
    %cst_7 = arith.constant dense<0.000000e+00> : vector<8xf32>
    %26 = vector.multi_reduction <add>, %25, %cst_7 [1] : vector<8x128xf32> to vector<8xf32>
    %27 = vector.shape_cast %26 : vector<8xf32> to vector<8x1xf32>
    %cst_8 = arith.constant 0.899999976 : f32
    %28 = vector.broadcast %cst_8 : f32 to vector<8x1xf32>
    %29 = arith.mulf %28, %23 : vector<8x1xf32>
    %30 = arith.subf %27, %23 : vector<8x1xf32>
    %cst_9 = arith.constant 7.87401571E-4 : f32
    %31 = vector.broadcast %cst_9 : f32 to vector<8x1xf32>
    %32 = arith.mulf %31, %30 : vector<8x1xf32>
    %33 = arith.addf %29, %32 : vector<8x1xf32>
    %cst_10 = arith.constant 0.000000e+00 : f32
    %34 = vector.broadcast %cst_10 : f32 to vector<8x1xf32>
    %35 = arith.subf %34, %33 : vector<8x1xf32>
    %36 = tpu.iota {dimensions = array<i32: 0>} : vector<8x1xi32>
    %c8_i32 = arith.constant 8 : i32
    %37 = vector.broadcast %c8_i32 : i32 to vector<8x1xi32>
    %38 = arith.cmpi slt, %36, %37 : vector<8x1xi32>
    %39 = arith.extui %38 : vector<8x1xi1> to vector<8x1xi32>
    %40 = arith.sitofp %39 : vector<8x1xi32> to vector<8x1xf32>
    %41 = arith.mulf %35, %40 : vector<8x1xf32>
    %42 = vector.shape_cast %41 : vector<8x1xf32> to vector<1x8x1xf32>
    %cst_11 = arith.constant dense<0.000000e+00> : vector<1xf32>
    %43 = vector.multi_reduction <add>, %42, %cst_11 [1, 2] : vector<1x8x1xf32> to vector<1xf32>
    %44 = vector.shape_cast %43 : vector<1xf32> to vector<1x1x1xf32>
    %45 = vector.extract %44[0, 0, 0] : f32 from vector<1x1x1xf32>
    %cst_12 = arith.constant 8.000000e+00 : f32
    %46 = arith.divf %45, %cst_12 : f32
    %c0_13 = arith.constant 0 : index
    %c0_14 = arith.constant 0 : index
    %47 = memref.load %arg2[%c0_13, %c0_14] : memref<1x1xf32, #tpu.memory_space<smem>>
    memref.store %46, %arg2[%c0_13, %c0_14] : memref<1x1xf32, #tpu.memory_space<smem>>
    return
  }
}

</mosaic_0001>

<bundles_post_ra>
// kernel: tpu_custom_call.1
= control target key start
LH: loop header
LB: loop body
LE: loop exit
PB: predicated region body
PF: predicated region fallthrough
CT: control target
= control target key end

     0   :  { %s147_s0 = inlined_call_operand.vmem [shape: f32[8,128], index: 0, kind: input, shape index: {}]   ;;  %s148_s1 = inlined_call_operand.vmem [shape: s32[8,1], index: 1, kind: input, shape index: {}]   ;;  %s149_s2 = inlined_call_operand.hbm [shape: f32[1,1], index: 2, kind: output, shape index: {}]  }
   0x1   :  { %v12_v0 = vld [vmem:[%s147_s0] sm:$0xff] }
   0x2   :  { %7 = vsyncpa [#allocation3], 0  ;;  %18 = vmax.xlane.f32.xlu0 %v12_v0  ;;  %v13_v1 = vld [vmem:[%s148_s1] sm:$0xff]  ;;  %v119_v2 = vmov 0   ;;  %v14_v7 = vlaneseq  ;;  %v120_v13 = vmov 0.0   ;;  %vm51_vm1 = vcmask 7168  }
   0x3   :  { %97 = vset.pattern.permute.xlu1 %v119_v2  ;;  %98 = vset.pattern.permute.xlu0 %v119_v2  ;;  %v121_v25 = vmov 8.0   ;;  %s78_s13 = sshll.u32 %s149_s2, 4  ;;  %s122_s17 = smov [#allocation2]   ;;  %s79_s13 = int_to_ptr.hbm [resolvable:$true] %s78_s13 }
   0x4   :  { %29 = vperm.xlu1 %97, %v13_v1   ;;  %v15_v9 = vand.u32 127, %v14_v7 }
  0x75   :  { %v19_v3 = vpop.xlane.xlu0 %18 }
  0x76   :  { %v20_v4 = vsub.f32 %v12_v0, %v19_v3  ;;  %v30_v10 = vpop.permute.xlu1 %29 }
  0x77   :  { %vm31_vm0 = vcmp.eq.s32.totalorder %v15_v9, %v30_v10 }
  0x78   :  { %v21_v5 = vmul.f32 1.442695, %v20_v4  ;;  %v88_v14 = vsel %vm31_vm0, 1.0, %v120_v13 }
  0x7a   :  { %99 = vpow2.f32 %v21_v5 }
  0x80   :  { %v100_v6 = vpop.eup %99 }
  0x81   :  { %23 = vadd.xlane.f32.xlu0 %v100_v6 }
  0xf4   :  { %v24_v8 = vpop.xlane.xlu0 %23 }
  0xf5   :  { %101 = vlog2.f32 %v24_v8 }
  0xf6   :  { %103 = vrcp.f32 %v121_v25 }
  0xfb   :  { %v102_v11 = vpop.eup %101 }
  0xfc   :  { %v26_v12 = vmul.f32 0.6931472, %v102_v11  ;;  %v104_v26 = vpop.eup %103 }
  0xfd   :  { %v63_v27 = vmul.f32 8.0, %v104_v26  ;;  %vm67_vm2 = vweird.f32 %v104_v26 }
  0xfe   :  { %v27_v15 = vsub.f32 %v20_v4, %v26_v12 }
  0xff   :  { %v64_v28 = vsub.f32 1.0, %v63_v27 }
 0x100   :  { %38 = vadd.xlane.f32.xlu2 %v27_v15  ;;  %v34_v16 = vmul.f32 %v88_v14, %v27_v15 }
 0x101   :  { %v65_v32 = vmul.f32 %v104_v26, %v64_v28 }
 0x102   :  { %35 = vadd.xlane.f32.xlu1 %v34_v16 }
 0x103   :  { %v66_v35 = vadd.f32 %v104_v26, %v65_v32 }
 0x105   :  { %v68_v38 = vsel %vm67_vm2, %v104_v26, %v66_v35 }
 0x173   :  { %v39_v17 = vpop.xlane.xlu2 %38 }
 0x175   :  { %v36_v18 = vpop.xlane.xlu1 %35 }
 0x176   :  { %v41_v19 = vsub.f32 %v39_v17, %v36_v18  ;;  %v40_v20 = vmul.f32 0.9, %v36_v18 }
 0x178   :  { %v42_v21 = vmul.f32 0.0007874016, %v41_v19 }
 0x17a   :  { %v43_v22 = vadd.f32 %v42_v21, %v40_v20 }
 0x17c   :  { %v44_v23 = vsub.f32 0.0, %v43_v22 }
 0x17e   :  { %v52_v24 = vsel %vm51_vm1, %v44_v23, 0.0 }
 0x17f   :  { %53 = vadd.xlane.f32.xlu2 %v52_v24 }
 0x1f2   :  { %v54_v29 = vpop.xlane.xlu2 %53 }
 0x1f3   :  { %v55_v30 = vrot.slane %v54_v29, 4 }
 0x1f5   :  { %v56_v31 = vadd.f32 %v55_v30, %v54_v29 }
 0x1f7   :  { %v57_v33 = vrot.slane %v56_v31, 2 }
 0x1f9   :  { %v58_v34 = vadd.f32 %v57_v33, %v56_v31 }
 0x1fb   :  { %v59_v36 = vrot.slane %v58_v34, 1 }
 0x1fd   :  { %v60_v37 = vadd.f32 %v59_v36, %v58_v34 }
 0x1ff   :  { %89 = vpush %v60_v37 }
 0x200   :  { %91 = vpush %v68_v38 }
 0x230   :  { %s90_s14 = spop %89 }
 0x231   :  { %s92_s15 = spop %91 }
 0x232   :  { %s70_s16 = smul.f32 %s92_s15, %s90_s14 }
 0x234   :  { %72 = sst [smem:[#allocation2]] %s70_s16 }
 0x235   :  { %81 = dma.smem_to_hbm %s122_s17, 16, %s79_s13, [#allocation3]  }
 0x236   :  { %117 = dma.done.wait [#allocation3], 16  }
 0x237   :  { %118 = vsyncadd [#allocation3], 4294967280 }
 0x238   :  { %86 = sfence }
 0x239   :  { %87 = vsyncpa [#allocation3], 1 }

</bundles_post_ra>
